<compile_context>
chip_gen: v6e
topology: v6e:2x2x1
jax: 0.10.0
libtpu: 0.0.40
codegen_flags: <defaults>
</compile_context>

<pallas_src>
import functools

import jax
import jax.numpy as jnp
from jax import lax
from jax.experimental import pallas as pl
from jax.experimental.pallas import tpu as pltpu


def _round_up(x, m):
    return ((x + m - 1) // m) * m


def _hashnet_kernel(u_ref, y_ref, ut_ref, yt_ref,
                    loss_acc_ref, pos_acc_ref, sim_acc_ref, *, n_valid):
    """Accumulate per-column partial sums of the HashNet exp-loss.

    Grid = (ncores, tiles_per_core): axis 0 is "parallel" (one accumulator row
    per core), axis 1 is the num_train reduction ("arbitrary").

    Accumulator refs are (1, TN) f32 blocks resident across axis 1:
      loss_acc += sum_over_batch(exp_loss)         (total)
      pos_acc  += sum_over_batch(sim * exp_loss)   (positive-pair part)
      sim_acc  += sum_over_batch(sim)              (-> S1)
    """
    c = pl.program_id(0)
    i = pl.program_id(1)

    @pl.when(i == 0)
    def _init():
        loss_acc_ref[...] = jnp.zeros_like(loss_acc_ref)
        pos_acc_ref[...] = jnp.zeros_like(pos_acc_ref)
        sim_acc_ref[...] = jnp.zeros_like(sim_acc_ref)

    u = u_ref[...]       # (B, bit)   bf16, already alpha * tanh(scale * u)
    y = y_ref[...]       # (B, C)     bf16
    ut = ut_ref[...]     # (bit, TN)  bf16 state tile (updated, pre-transposed)
    yt = yt_ref[...]     # (C, TN)    bf16 state tile

    # MXU: bf16 x bf16 -> f32 accumulate.
    yY = jnp.dot(y, yt, preferred_element_type=jnp.float32)     # (B, TN)
    dot = jnp.dot(u, ut, preferred_element_type=jnp.float32)    # (B, TN), alpha folded

    sim = (yY > 0.0).astype(jnp.float32)
    # All elementwise / transcendental math in f32 (v5e has no bf16 VPU/EUP).
    exp_loss = (jnp.log(1.0 + jnp.exp(-jnp.abs(dot)))
                + jnp.maximum(dot, 0.0)
                - sim * dot)

    if n_valid is not None:
        # Mask padded num_train columns (they'd otherwise contribute log(2)).
        tn = ut_ref.shape[1]
        col = (c * pl.num_programs(1) + i) * tn + lax.broadcasted_iota(
            jnp.int32, (1, tn), 1)
        valid = col < n_valid                      # (1, TN) bool
        exp_loss = jnp.where(valid, exp_loss, 0.0)
        sim = jnp.where(valid, sim, 0.0)

    # Sublane-only reductions into lane-dense accumulators.
    loss_acc_ref[...] += jnp.sum(exp_loss, axis=0, keepdims=True)
    pos_acc_ref[...] += jnp.sum(sim * exp_loss, axis=0, keepdims=True)
    sim_acc_ref[...] += jnp.sum(sim, axis=0, keepdims=True)


def make_hashnet_loss(num_train, bit, num_classes, *, scale=1.0, alpha=0.1,
                      tn=8192, ncores=2, state_dtype=jnp.bfloat16):
    """Builds (init_state, step) for the HashNet loss.

    State is pre-transposed ((bit, N_pad), (num_classes, N_pad)) in
    `state_dtype`; `step(u, y, ind, UT, YT) -> (loss, UT_new, YT_new)` with
    UT/YT donated so the B-column scatter update is in place.
    """
    assert tn % 128 == 0, "tile must be a multiple of the 128-lane width"
    # Clamp the tile so small problems aren't padded out to 8192 columns.
    tn_eff = min(tn, _round_up(-(-num_train // ncores), 128))
    n_pad = _round_up(num_train, tn_eff * ncores)
    tiles_per_core = n_pad // tn_eff // ncores
    n_valid = num_train if n_pad != num_train else None

    kernel = functools.partial(_hashnet_kernel, n_valid=n_valid)

    def init_state():
        return (jnp.zeros((bit, n_pad), state_dtype),
                jnp.zeros((num_classes, n_pad), state_dtype))

    @functools.partial(jax.jit, donate_argnums=(3, 4))
    def step(u, y, ind, UT, YT):
        u = u.astype(jnp.float32)
        y = y.astype(jnp.float32)
        B = u.shape[0]

        # --- state update (in place thanks to donation) -------------------
        u_t = jnp.tanh(scale * u)                                  # (B, bit)
        UT_new = UT.at[:, ind].set(u_t.T.astype(state_dtype))      # (bit, N_pad)
        YT_new = YT.at[:, ind].set(y.T.astype(state_dtype))        # (C, N_pad)

        # alpha folded into the batch-side operand (state keeps plain tanh).
        u_in = (alpha * u_t).astype(state_dtype)                   # (B, bit)
        y_in = y.astype(state_dtype)                               # (B, C)

        acc_spec = pl.BlockSpec((None, 1, tn_eff), lambda c, i: (c, 0, 0))
        acc_shape = jax.ShapeDtypeStruct((ncores, 1, tn_eff), jnp.float32)

        out_loss, out_pos, out_sim = pl.pallas_call(
            kernel,
            out_shape=(acc_shape, acc_shape, acc_shape),
            grid_spec=pltpu.PrefetchScalarGridSpec(
                num_scalar_prefetch=0,
                grid=(ncores, tiles_per_core),
                in_specs=[
                    pl.BlockSpec((B, bit), lambda c, i: (0, 0)),
                    pl.BlockSpec((B, num_classes), lambda c, i: (0, 0)),
                    pl.BlockSpec((bit, tn_eff),
                                 lambda c, i: (0, c * tiles_per_core + i)),
                    pl.BlockSpec((num_classes, tn_eff),
                                 lambda c, i: (0, c * tiles_per_core + i)),
                ],
                out_specs=[acc_spec, acc_spec, acc_spec],
            ),
            compiler_params=pltpu.CompilerParams(
                dimension_semantics=("parallel", "arbitrary")),
        )(u_in, y_in, UT_new, YT_new)

        total = jnp.sum(out_loss)
        pos_sum = jnp.sum(out_pos)
        s1 = jnp.sum(out_sim)
        S = jnp.float32(B * num_train)
        s0 = S - s1
        neg_sum = total - pos_sum
        # sum(pos*(S/S1) + neg*(S/S0))/S == pos_sum/S1 + neg_sum/S0
        # NOTE: same S1==0 / S0==0 division hazard as the PyTorch module.
        loss = pos_sum / s1 + neg_sum / s0
        return loss, UT_new, YT_new

    return init_state, step


def _reference_loss(u, y, ind, U, Y, scale=1.0, alpha=0.1,
                    stream_dtype=jnp.bfloat16):
    """Pure-JAX reference mirroring the PyTorch forward; matmul operands are
    rounded to `stream_dtype` exactly as the kernel streams them (f32 acc)."""
    u = u.astype(jnp.float32)
    y = y.astype(jnp.float32)
    u_t = jnp.tanh(scale * u)
    U_new = U.at[ind, :].set(u_t)
    Y_new = Y.at[ind, :].set(y)

    uq = (alpha * u_t).astype(stream_dtype)
    yq = y.astype(stream_dtype)
    Uq = U_new.astype(stream_dtype)
    Yq = Y_new.astype(stream_dtype)

    similarity = (jnp.dot(yq, Yq.T, preferred_element_type=jnp.float32)
                  > 0).astype(jnp.float32)
    dot = jnp.dot(uq, Uq.T, preferred_element_type=jnp.float32)
    exp_loss = (jnp.log(1.0 + jnp.exp(-jnp.abs(dot)))
                + jnp.maximum(dot, 0.0) - similarity * dot)
    mask_pos = similarity > 0
    S1 = jnp.sum(similarity)
    S0 = jnp.sum(1.0 - similarity)
    S = S0 + S1
    exp_loss = jnp.where(mask_pos, exp_loss * (S / S1), exp_loss * (S / S0))
    return jnp.sum(exp_loss) / S


if __name__ == "__main__":
    B, BIT, C = 8, 32, 16

    key = jax.random.PRNGKey(0)
    k_u, k_u2, k_lbl, k_lbl2, k_ind, k_ind2, k_ind3 = jax.random.split(key, 7)

    u = jax.random.normal(k_u, (B, BIT), dtype=jnp.float32)
    y = jax.nn.one_hot(jax.random.randint(k_lbl, (B,), 0, C), C,
                       dtype=jnp.float32)

    # ---- Test 1: num_train a multiple of the tile (no padding path) -------
    N1 = 256
    ind1 = jax.random.permutation(k_ind, N1)[:B]
    init1, step1 = make_hashnet_loss(N1, BIT, C, scale=1.0, alpha=0.1)
    UT0, YT0 = init1()
    loss1, UT1, YT1 = step1(u, y, ind1, UT0, YT0)
    jax.block_until_ready(loss1)

    ref1 = _reference_loss(u, y, ind1,
                           jnp.zeros((N1, BIT), jnp.float32),
                           jnp.zeros((N1, C), jnp.float32))
    assert jnp.allclose(loss1, ref1, rtol=1e-3, atol=1e-5), (loss1, ref1)

    # Light check that the pre-transposed bf16 state was updated correctly.
    U_exp = jnp.zeros((N1, BIT), jnp.float32).at[ind1].set(jnp.tanh(u))
    assert jnp.allclose(UT1.T.astype(jnp.float32), U_exp,
                        rtol=2e-2, atol=5e-3), "state mismatch"

    # ---- Test 2: num_train NOT a multiple of the tile (masked padding), ----
    # ---- plus a chained second call exercising in-place state donation. ----
    N2 = 200
    init2, step2 = make_hashnet_loss(N2, BIT, C, scale=1.0, alpha=0.1)
    UT, YT = init2()
    ind2 = jax.random.permutation(k_ind2, N2)[:B]
    loss2, UT, YT = step2(u, y, ind2, UT, YT)
    ref2 = _reference_loss(u, y, ind2,
                           jnp.zeros((N2, BIT), jnp.float32),
                           jnp.zeros((N2, C), jnp.float32))
    assert jnp.allclose(loss2, ref2, rtol=1e-3, atol=1e-5), (loss2, ref2)

    u2 = jax.random.normal(k_u2, (B, BIT), dtype=jnp.float32)
    y2 = jax.nn.one_hot(jax.random.randint(k_lbl2, (B,), 0, C), C,
                        dtype=jnp.float32)
    ind3 = jax.random.permutation(k_ind3, N2)[:B]
    loss3, UT, YT = step2(u2, y2, ind3, UT, YT)
    jax.block_until_ready(loss3)

    U_ref = jnp.zeros((N2, BIT), jnp.float32).at[ind2].set(jnp.tanh(u))
    Y_ref = jnp.zeros((N2, C), jnp.float32).at[ind2].set(y)
    ref3 = _reference_loss(u2, y2, ind3, U_ref, Y_ref)
    assert jnp.allclose(loss3, ref3, rtol=1e-3, atol=1e-5), (loss3, ref3)

    print("KERNEL_OK")
</pallas_src>

<mosaic_0001>
module attributes {stable_mosaic.version = 11 : i64} {
  func.func @_hashnet_kernel(%arg0: i32, %arg1: i32, %arg2: memref<8x32xbf16, #tpu.memory_space<vmem>>, %arg3: memref<8x16xbf16, #tpu.memory_space<vmem>>, %arg4: memref<32x128xbf16, #tpu.memory_space<vmem>>, %arg5: memref<16x128xbf16, #tpu.memory_space<vmem>>, %arg6: memref<1x1x128xf32, #tpu.memory_space<vmem>>, %arg7: memref<1x1x128xf32, #tpu.memory_space<vmem>>, %arg8: memref<1x1x128xf32, #tpu.memory_space<vmem>>) attributes {dimension_semantics = [#tpu.dimension_semantics<parallel>, #tpu.dimension_semantics<arbitrary>], iteration_bounds = array<i64: 2, 1>, scalar_prefetch = 0 : i64, scratch_operands = 0 : i64, tpu.core_type = #tpu.core_type<tc>, window_params = [{pipeline_mode = #tpu.pipeline_mode<synchronous>, transform_indices = @transform_0, window_bounds = array<i64: 8, 32>}, {pipeline_mode = #tpu.pipeline_mode<synchronous>, transform_indices = @transform_1, window_bounds = array<i64: 8, 16>}, {transform_indices = @transform_2, window_bounds = array<i64: 32, 128>}, {transform_indices = @transform_3, window_bounds = array<i64: 16, 128>}, {transform_indices = @transform_4, window_bounds = array<i64: 1, 1, 128>}, {transform_indices = @transform_5, window_bounds = array<i64: 1, 1, 128>}, {transform_indices = @transform_6, window_bounds = array<i64: 1, 1, 128>}]} {
    %c0_i32 = arith.constant 0 : i32
    %0 = arith.cmpi eq, %arg1, %c0_i32 : i32
    %1 = arith.extui %0 : i1 to i32
    %c0_i32_0 = arith.constant 0 : i32
    %2 = arith.cmpi ne, %1, %c0_i32_0 : i32
    scf.if %2 {
      %cst_34 = arith.constant 0.000000e+00 : f32
      %50 = vector.broadcast %cst_34 : f32 to vector<1x128xf32>
      %c0_35 = arith.constant 0 : index
      %c0_36 = arith.constant 0 : index
      %c0_37 = arith.constant 0 : index
      %51 = vector.load %arg6[%c0_35, %c0_36, %c0_37] : memref<1x1x128xf32, #tpu.memory_space<vmem>>, vector<1x1x128xf32>
      %52 = vector.shape_cast %51 : vector<1x1x128xf32> to vector<1x128xf32>
      %53 = vector.shape_cast %50 : vector<1x128xf32> to vector<1x1x128xf32>
      tpu.vector_store %arg6[%c0_35, %c0_36, %c0_37], %53 {strides = array<i32>} : memref<1x1x128xf32, #tpu.memory_space<vmem>>, vector<1x1x128xf32>,
      %cst_38 = arith.constant 0.000000e+00 : f32
      %54 = vector.broadcast %cst_38 : f32 to vector<1x128xf32>
      %c0_39 = arith.constant 0 : index
      %c0_40 = arith.constant 0 : index
      %c0_41 = arith.constant 0 : index
      %55 = vector.load %arg7[%c0_39, %c0_40, %c0_41] : memref<1x1x128xf32, #tpu.memory_space<vmem>>, vector<1x1x128xf32>
      %56 = vector.shape_cast %55 : vector<1x1x128xf32> to vector<1x128xf32>
      %57 = vector.shape_cast %54 : vector<1x128xf32> to vector<1x1x128xf32>
      tpu.vector_store %arg7[%c0_39, %c0_40, %c0_41], %57 {strides = array<i32>} : memref<1x1x128xf32, #tpu.memory_space<vmem>>, vector<1x1x128xf32>,
      %cst_42 = arith.constant 0.000000e+00 : f32
      %58 = vector.broadcast %cst_42 : f32 to vector<1x128xf32>
      %c0_43 = arith.constant 0 : index
      %c0_44 = arith.constant 0 : index
      %c0_45 = arith.constant 0 : index
      %59 = vector.load %arg8[%c0_43, %c0_44, %c0_45] : memref<1x1x128xf32, #tpu.memory_space<vmem>>, vector<1x1x128xf32>
      %60 = vector.shape_cast %59 : vector<1x1x128xf32> to vector<1x128xf32>
      %61 = vector.shape_cast %58 : vector<1x128xf32> to vector<1x1x128xf32>
      tpu.vector_store %arg8[%c0_43, %c0_44, %c0_45], %61 {strides = array<i32>} : memref<1x1x128xf32, #tpu.memory_space<vmem>>, vector<1x1x128xf32>,
    } else {
    }
    %c0 = arith.constant 0 : index
    %c0_1 = arith.constant 0 : index
    %3 = vector.load %arg2[%c0, %c0_1] : memref<8x32xbf16, #tpu.memory_space<vmem>>, vector<8x32xbf16>
    %c0_2 = arith.constant 0 : index
    %c0_3 = arith.constant 0 : index
    %4 = vector.load %arg3[%c0_2, %c0_3] : memref<8x16xbf16, #tpu.memory_space<vmem>>, vector<8x16xbf16>
    %c0_4 = arith.constant 0 : index
    %c0_5 = arith.constant 0 : index
    %5 = vector.load %arg4[%c0_4, %c0_5] : memref<32x128xbf16, #tpu.memory_space<vmem>>, vector<32x128xbf16>
    %c0_6 = arith.constant 0 : index
    %c0_7 = arith.constant 0 : index
    %6 = vector.load %arg5[%c0_6, %c0_7] : memref<16x128xbf16, #tpu.memory_space<vmem>>, vector<16x128xbf16>
    %cst = arith.constant dense<0.000000e+00> : vector<8x128xf32>
    %7 = tpu.matmul %4, %6, %cst {dimension_numbers = #tpu.dot_dimension_numbers<[1], [0], [0], [1], [0, 0, 1, 1], [], []>} : vector<8x16xbf16>, vector<16x128xbf16>, vector<8x128xf32> -> vector<8x128xf32>
    %cst_8 = arith.constant dense<0.000000e+00> : vector<8x128xf32>
    %8 = tpu.matmul %3, %5, %cst_8 {dimension_numbers = #tpu.dot_dimension_numbers<[1], [0], [0], [1], [0, 0, 1, 1], [], []>} : vector<8x32xbf16>, vector<32x128xbf16>, vector<8x128xf32> -> vector<8x128xf32>
    %cst_9 = arith.constant 0.000000e+00 : f32
    %9 = vector.broadcast %cst_9 : f32 to vector<8x128xf32>
    %10 = arith.cmpf ogt, %7, %9 : vector<8x128xf32>
    %11 = arith.extui %10 : vector<8x128xi1> to vector<8x128xi32>
    %12 = arith.sitofp %11 : vector<8x128xi32> to vector<8x128xf32>
    %13 = math.absf %8 : vector<8x128xf32>
    %cst_10 = arith.constant 0.000000e+00 : f32
    %14 = vector.broadcast %cst_10 : f32 to vector<8x128xf32>
    %15 = arith.subf %14, %13 : vector<8x128xf32>
    %16 = math.exp %15 : vector<8x128xf32>
    %cst_11 = arith.constant 1.000000e+00 : f32
    %17 = vector.broadcast %cst_11 : f32 to vector<8x128xf32>
    %18 = arith.addf %17, %16 : vector<8x128xf32>
    %19 = math.log %18 : vector<8x128xf32>
    %cst_12 = arith.constant 0.000000e+00 : f32
    %20 = vector.broadcast %cst_12 : f32 to vector<8x128xf32>
    %21 = arith.maximumf %8, %20 : vector<8x128xf32>
    %22 = arith.addf %19, %21 : vector<8x128xf32>
    %23 = arith.mulf %12, %8 : vector<8x128xf32>
    %24 = arith.subf %22, %23 : vector<8x128xf32>
    %c0_13 = arith.constant 0 : index
    %c0_14 = arith.constant 0 : index
    %c0_15 = arith.constant 0 : index
    %25 = vector.load %arg6[%c0_13, %c0_14, %c0_15] : memref<1x1x128xf32, #tpu.memory_space<vmem>>, vector<1x1x128xf32>
    %26 = vector.shape_cast %25 : vector<1x1x128xf32> to vector<1x128xf32>
    %cst_16 = arith.constant dense<0.000000e+00> : vector<128xf32>
    %27 = vector.multi_reduction <add>, %24, %cst_16 [0] : vector<8x128xf32> to vector<128xf32>
    %28 = vector.shape_cast %27 : vector<128xf32> to vector<1x128xf32>
    %29 = arith.addf %26, %28 : vector<1x128xf32>
    %c0_17 = arith.constant 0 : index
    %c0_18 = arith.constant 0 : index
    %c0_19 = arith.constant 0 : index
    %30 = vector.load %arg6[%c0_17, %c0_18, %c0_19] : memref<1x1x128xf32, #tpu.memory_space<vmem>>, vector<1x1x128xf32>
    %31 = vector.shape_cast %30 : vector<1x1x128xf32> to vector<1x128xf32>
    %32 = vector.shape_cast %29 : vector<1x128xf32> to vector<1x1x128xf32>
    tpu.vector_store %arg6[%c0_17, %c0_18, %c0_19], %32 {strides = array<i32>} : memref<1x1x128xf32, #tpu.memory_space<vmem>>, vector<1x1x128xf32>,
    %c0_20 = arith.constant 0 : index
    %c0_21 = arith.constant 0 : index
    %c0_22 = arith.constant 0 : index
    %33 = vector.load %arg7[%c0_20, %c0_21, %c0_22] : memref<1x1x128xf32, #tpu.memory_space<vmem>>, vector<1x1x128xf32>
    %34 = vector.shape_cast %33 : vector<1x1x128xf32> to vector<1x128xf32>
    %35 = arith.mulf %12, %24 : vector<8x128xf32>
    %cst_23 = arith.constant dense<0.000000e+00> : vector<128xf32>
    %36 = vector.multi_reduction <add>, %35, %cst_23 [0] : vector<8x128xf32> to vector<128xf32>
    %37 = vector.shape_cast %36 : vector<128xf32> to vector<1x128xf32>
    %38 = arith.addf %34, %37 : vector<1x128xf32>
    %c0_24 = arith.constant 0 : index
    %c0_25 = arith.constant 0 : index
    %c0_26 = arith.constant 0 : index
    %39 = vector.load %arg7[%c0_24, %c0_25, %c0_26] : memref<1x1x128xf32, #tpu.memory_space<vmem>>, vector<1x1x128xf32>
    %40 = vector.shape_cast %39 : vector<1x1x128xf32> to vector<1x128xf32>
    %41 = vector.shape_cast %38 : vector<1x128xf32> to vector<1x1x128xf32>
    tpu.vector_store %arg7[%c0_24, %c0_25, %c0_26], %41 {strides = array<i32>} : memref<1x1x128xf32, #tpu.memory_space<vmem>>, vector<1x1x128xf32>,
    %c0_27 = arith.constant 0 : index
    %c0_28 = arith.constant 0 : index
    %c0_29 = arith.constant 0 : index
    %42 = vector.load %arg8[%c0_27, %c0_28, %c0_29] : memref<1x1x128xf32, #tpu.memory_space<vmem>>, vector<1x1x128xf32>
    %43 = vector.shape_cast %42 : vector<1x1x128xf32> to vector<1x128xf32>
    %cst_30 = arith.constant dense<0.000000e+00> : vector<128xf32>
    %44 = vector.multi_reduction <add>, %12, %cst_30 [0] : vector<8x128xf32> to vector<128xf32>
    %45 = vector.shape_cast %44 : vector<128xf32> to vector<1x128xf32>
    %46 = arith.addf %43, %45 : vector<1x128xf32>
    %c0_31 = arith.constant 0 : index
    %c0_32 = arith.constant 0 : index
    %c0_33 = arith.constant 0 : index
    %47 = vector.load %arg8[%c0_31, %c0_32, %c0_33] : memref<1x1x128xf32, #tpu.memory_space<vmem>>, vector<1x1x128xf32>
    %48 = vector.shape_cast %47 : vector<1x1x128xf32> to vector<1x128xf32>
    %49 = vector.shape_cast %46 : vector<1x128xf32> to vector<1x1x128xf32>
    tpu.vector_store %arg8[%c0_31, %c0_32, %c0_33], %49 {strides = array<i32>} : memref<1x1x128xf32, #tpu.memory_space<vmem>>, vector<1x1x128xf32>,
    return
  }
  func.func @transform_0(%arg0: i32, %arg1: i32) -> (i32, i32) {
    %c0_i32 = arith.constant 0 : i32
    %c0_i32_0 = arith.constant 0 : i32
    %c0_i32_1 = arith.constant 0 : i32
    return %c0_i32, %c0_i32_0 : i32, i32
  }
  func.func @transform_1(%arg0: i32, %arg1: i32) -> (i32, i32) {
    %c0_i32 = arith.constant 0 : i32
    %c0_i32_0 = arith.constant 0 : i32
    %c0_i32_1 = arith.constant 0 : i32
    return %c0_i32, %c0_i32_0 : i32, i32
  }
  func.func @transform_2(%arg0: i32, %arg1: i32) -> (i32, i32) {
    %c1_i32 = arith.constant 1 : i32
    %0 = arith.muli %arg0, %c1_i32 : i32
    %1 = arith.addi %0, %arg1 : i32
    %c0_i32 = arith.constant 0 : i32
    %c0_i32_0 = arith.constant 0 : i32
    return %c0_i32, %1 : i32, i32
  }
  func.func @transform_3(%arg0: i32, %arg1: i32) -> (i32, i32) {
    %c1_i32 = arith.constant 1 : i32
    %0 = arith.muli %arg0, %c1_i32 : i32
    %1 = arith.addi %0, %arg1 : i32
    %c0_i32 = arith.constant 0 : i32
    %c0_i32_0 = arith.constant 0 : i32
    return %c0_i32, %1 : i32, i32
  }
  func.func @transform_4(%arg0: i32, %arg1: i32) -> (i32, i32, i32) {
    %c0_i32 = arith.constant 0 : i32
    %c0_i32_0 = arith.constant 0 : i32
    %c0_i32_1 = arith.constant 0 : i32
    return %arg0, %c0_i32, %c0_i32_0 : i32, i32, i32
  }
  func.func @transform_5(%arg0: i32, %arg1: i32) -> (i32, i32, i32) {
    %c0_i32 = arith.constant 0 : i32
    %c0_i32_0 = arith.constant 0 : i32
    %c0_i32_1 = arith.constant 0 : i32
    return %arg0, %c0_i32, %c0_i32_0 : i32, i32, i32
  }
  func.func @transform_6(%arg0: i32, %arg1: i32) -> (i32, i32, i32) {
    %c0_i32 = arith.constant 0 : i32
    %c0_i32_0 = arith.constant 0 : i32
    %c0_i32_1 = arith.constant 0 : i32
    return %arg0, %c0_i32, %c0_i32_0 : i32, i32, i32
  }
}

</mosaic_0001>

<bundles_post_ra>
// kernel: step.1
= control target key start
LH: loop header
LB: loop body
LE: loop exit
PB: predicated region body
PF: predicated region fallthrough
CT: control target
= control target key end

     0   :  { %s866_s21 = smov 0   ;;  %s868_s22 = smov 0   ;;  %s972_s0 = inlined_call_operand.vmem [shape: bf16[8,32], index: 0, kind: input, shape index: {}]   ;;  %s973_s1 = inlined_call_operand.vmem [shape: bf16[8,16], index: 1, kind: input, shape index: {}]   ;;  %s974_s2 = inlined_call_operand.vmem [shape: bf16[32,256], index: 2, kind: input, shape index: {}]   ;;  %s975_s3 = inlined_call_operand.vmem [shape: bf16[16,256], index: 3, kind: input, shape index: {}]   ;;  %s976_s4 = inlined_call_operand.vmem [shape: f32[2,1,128], index: 4, kind: output, shape index: {0}]   ;;  %s977_s5 = inlined_call_operand.vmem [shape: f32[2,1,128], index: 5, kind: output, shape index: {1}]   ;;  %s978_s6 = inlined_call_operand.vmem [shape: f32[2,1,128], index: 6, kind: output, shape index: {2}]  }
   0x1   :  { %s870_s23 = smov 0   ;;  %s872_s24 = smov 0  }
   0x2   :  { %s874_s25 = smov 0  }
   0x3 LB: > { %s29_s26 = sadd.s32 1, %s823_s24  ;;  %p87_p1 = scmp.ne.s32.totalorder %s815_s22, %s811_s21  ;;  %s827_s25 = sphi %s874_s25, %s17_s25   ;;  %s823_s24 = sphi %s872_s24, %s983_s24   ;;  %s819_s23 = sphi %s870_s23, %s982_s23   ;;  %s815_s22 = sphi %s868_s22, %s981_s22   ;;  %s811_s21 = sphi %s866_s21, %s980_s21  }
   0x4   : > { %p31_p0 = scmp.ge.s32.totalorder %s29_s26, 2  ;;  %p88_p2 = scmp.eq.s32.totalorder %s827_s25, 0 }
   0x5   : > { %s80_s29 = sadd.s32 1, %s815_s22  ;;  %p705_p5 = scmp.ge.s32.totalorder %s827_s25, 2 }
   0x6   : > { %s985_s26 = smov (%p31_p0, %s29_s26), 0  ;;  %p897_p3 = por %p88_p2, %p87_p1 }
   0x7   : > { %s77_s28 = ssub.s32 %s823_s24, %s985_s26  ;;  %225 = sbr.rel (%p705_p5) target bundleno = 23 (0x17), region = 24 }
   0x8   : > { %p78_p4 = scmp.eq.s32.totalorder %s77_s28, 0 }
   0xa   : > { %s905_s30 = scalar_select %p78_p4, %s815_s22, %s80_s29  }
   0xc   : > { %228 = sbr.rel (!%p897_p3) target bundleno = 18 (0x12), region = 28  ;;  %s230_s7 = sand.u32 (%p897_p3), 1, %s815_s22  }
   0xd   : > { %s707_s8 = sshll.u32 (%p897_p3), %s823_s24, 2  ;;  %s706_s9 = sshll.u32 (%p897_p3), %s230_s7, 4 }
   0xe   : > { %s235_s12 = scalar_lea.vmem (%p897_p3), %s974_s2, %s707_s8  ;;  %s232_s13 = scalar_lea.vmem (%p897_p3), [#allocation2], %s706_s9 }
   0xf   : > { %v252_v0 = vld [vmem:[%s235_s12] sm:$0xf] (%p897_p3)  ;;  %v254_v1 = vld [vmem:[%s235_s12 + $0x8] sm:$0xf] (%p897_p3)  ;;  %v256_v2 = vld [vmem:[%s235_s12 + $0x10] sm:$0xf] (%p897_p3) }
  0x10   : > { %253 = vst [vmem:[%s232_s13] sm:$0xf] (%p897_p3), %v252_v0  ;;  %255 = vst [vmem:[%s232_s13 + $0x4] sm:$0xf] (%p897_p3), %v254_v1  ;;  %v258_v3 = vld [vmem:[%s235_s12 + $0x18] sm:$0xf] (%p897_p3) }
  0x11   : > { %257 = vst [vmem:[%s232_s13 + $0x8] sm:$0xf] %v256_v2  ;;  %259 = vst [vmem:[%s232_s13 + $0xc] sm:$0xf] %v258_v3 }
  0x12 PF: > { %291 = sbr.rel (!%p897_p3) target bundleno = 23 (0x17), region = 69  ;;  %s293_s14 = sand.u32 (%p897_p3), 1, %s815_s22  }
  0x13   : > { %s709_s15 = sshll.u32 (%p897_p3), %s823_s24, 2  ;;  %s708_s16 = sshll.u32 (%p897_p3), %s293_s14, 3 }
  0x14   : > { %s298_s19 = scalar_lea.vmem (%p897_p3), %s975_s3, %s709_s15  ;;  %s295_s20 = scalar_lea.vmem (%p897_p3), [#allocation3], %s708_s16 }
  0x15   : > { %v315_v4 = vld [vmem:[%s298_s19] sm:$0xf] (%p897_p3)  ;;  %v317_v5 = vld [vmem:[%s298_s19 + $0x8] sm:$0xf] (%p897_p3) }
  0x16   : > { %316 = vst [vmem:[%s295_s20] sm:$0xf] (%p897_p3), %v315_v4  ;;  %318 = vst [vmem:[%s295_s20 + $0x4] sm:$0xf] (%p897_p3), %v317_v5 }
  0x17 PF: > { %p710_p6 = scmp.ge.s32.totalorder %s827_s25, 1  ;;  %p345_p7 = scmp.lt.s32.totalorder %s827_s25, 3 }
  0x19   : > { %p346_p8 = pnand %p710_p6, %p345_p7 }
  0x1a   : > { %s352_s27 = sand.u32 (!%p346_p8), 1, %s811_s21   ;;  %p398_p9 = scmp.lt.s32.totalorder (!%p346_p8), %s819_s23, 1 }
  0x1b   : > { %349 = sbr.rel (%p346_p8) target bundleno = 294 (0x126), region = 110  ;;  %s711_s28 = sshll.u32 (!%p346_p8), %s352_s27, 4 }
  0x1c   : > { %s712_s29 = sshll.u32 (!%p346_p8), %s352_s27, 3  ;;  %s354_s7 = scalar_lea.vmem (!%p346_p8), [#allocation2], %s711_s28 }
  0x1d   : > { %s361_s8 = scalar_lea.vmem (!%p346_p8), [#allocation3], %s712_s29 }
  0x20   : > { %v829_v6 = vmov 0.0   ;;  %vm830_vm0 = vmmov 0   ;;  %v782_v7 = vld [vmem:[%s354_s7 + $0x8] sm:$0xff]   ;;  %v783_v8 = vld [vmem:[%s361_s8] sm:$0xff]   ;;  %s987_s23 = smov (!%p398_p9, %s819_s23), 1  ;;  %vm429_vm1 = vcmask 130048  }
  0x21   : > { %732 = vmatprep.subr.bf16.mxu1 %v829_v6  ;;  %726 = vmatprep.subr.bf16.mxu0 %v829_v6  ;;  %v784_v9 = vld [vmem:[%s354_s7] sm:$0xff]   ;;  %s933_s12 = scalar_lea.vmem %s978_s6, %s987_s23  ;;  %vm485_vm2 = vcmask 261120   ;;  %s942_s17 = scalar_lea.vmem %s976_s4, %s987_s23 }
  0x22   : > { %728 = vmatprep.mubr.msk.bf16.mxu0 %vm830_vm0, %v829_v6  ;;  %736 = vmatprep.mubr.msk.bf16.mxu1 %vm830_vm0, %v829_v6  ;;  %v416_v10 = vld [vmem:[%s973_s1] sm:$0xf]  ;;  %414 = vst [vmem:[%s933_s12] sm:$0x1] %v829_v6  ;;  %s947_s20 = scalar_lea.vmem %s977_s5, %s987_s23  ;;  %412 = vst [vmem:[%s942_s17] sm:$0x1] %v829_v6 }
  0x23   : > { %733 = vmatpush3.bf16.msra.mxu1 %v782_v7  ;;  %727 = vmatpush3.bf16.msra.mxu0 %v783_v8  ;;  %v415_v11 = vld [vmem:[%s972_s0] sm:$0xf]  ;;  %413 = vst [vmem:[%s947_s20] sm:$0x1] %v829_v6 }
  0x24   : > { %734 = vmatprep.subr.bf16.mxu1 %v829_v6 }
  0x26   : > { %729 = vmatmul.mubr.msk.bf16.vlgmr.msra.gmra.mxu0 %vm429_vm1, %v416_v10 }
  0x27   : > { %735 = vmatpush3.bf16.msra.mxu1 %v784_v9 }
  0x29   : > { %v562_v29 = vld [vmem:[%s933_s12] sm:$0x1] }
  0x2a   : > { %737 = vmatmul.mubr.msk.bf16.vlgmr.msra.gmra.mxu1 %vm485_vm2, %v415_v11  ;;  %v543_v50 = vld [vmem:[%s942_s17] sm:$0x1] }
  0x2b   : > { %v552_v53 = vld [vmem:[%s947_s20] sm:$0x1] }
  0xe6   : > { %v467_v12 = vpop.f32.mrf.mxu0 }
  0xe7   : > { %vm529_vm3 = vcmp.gt.f32.partialorder %v467_v12, 0.0 }
  0xe8   : > { %v718_v13 = vsel %vm529_vm3, 1.0, %v829_v6  ;;  %v730_v14 = vpop.f32.mrf.mxu0 }
  0xe9   : > { %v563_v15 = vrot.slane %v718_v13, 4 }
  0xea   : > { %v523_v16 = vpop.f32.mrf.mxu1  ;;  %v470_v18 = vpop.f32.mrf.mxu0 }
  0xeb   : > { %v532_v17 = vand.u32 2147483647, %v523_v16  ;;  %v564_v19 = vadd.f32 %v718_v13, %v563_v15  ;;  %v539_v36 = vmax.f32 %v523_v16, 0.0  ;;  %v541_v38 = vmul.f32 %v718_v13, %v523_v16 }
  0xec   : > { %v738_v20 = vpop.f32.mrf.mxu1  ;;  %v731_v22 = vpop.f32.mrf.mxu0 }
  0xed   : > { %v533_v21 = vsub.f32 0.0, %v532_v17  ;;  %v565_v23 = vrot.slane %v564_v19, 2 }
  0xee   : > { %v526_v24 = vpop.f32.mrf.mxu1 }
  0xef   : > { %v534_v25 = vmul.f32 1.442695, %v533_v21  ;;  %v566_v26 = vadd.f32 %v565_v23, %v564_v19 }
  0xf0   : > { %v739_v27 = vpop.f32.mrf.mxu1 }
  0xf1   : > { %785 = vpow2.f32 %v534_v25  ;;  %v567_v28 = vrot.slane %v566_v26, 1 }
  0xf3   : > { %v568_v30 = vadd.f32 %v567_v28, %v566_v26 }
  0xf5   : > { %v569_v31 = vadd.f32 %v568_v30, %v562_v29 }
  0xf7   : > { %570 = vst [vmem:[%s933_s12] sm:$0x1] %v569_v31 }
  0xfe   : > { %v786_v32 = vpop.eup %785 }
  0xff   : > { %v536_v33 = vadd.f32 1.0, %v786_v32 }
 0x101   : > { %787 = vlog2.f32 %v536_v33 }
 0x10e   : > { %v788_v34 = vpop.eup %787 }
 0x10f   : > { %v538_v35 = vmul.f32 0.6931472, %v788_v34 }
 0x111   : > { %v540_v37 = vadd.f32 %v539_v36, %v538_v35 }
 0x113   : > { %v542_v39 = vsub.f32 %v540_v37, %v541_v38 }
 0x115   : > { %v544_v40 = vrot.slane %v542_v39, 4  ;;  %v553_v41 = vmul.f32 %v718_v13, %v542_v39 }
 0x117   : > { %v545_v42 = vadd.f32 %v544_v40, %v542_v39  ;;  %v554_v43 = vrot.slane %v553_v41, 4 }
 0x119   : > { %v546_v44 = vrot.slane %v545_v42, 2  ;;  %v555_v45 = vadd.f32 %v554_v43, %v553_v41 }
 0x11b   : > { %v547_v46 = vadd.f32 %v546_v44, %v545_v42  ;;  %v556_v47 = vrot.slane %v555_v45, 2 }
 0x11d   : > { %v548_v48 = vrot.slane %v547_v46, 1  ;;  %v557_v49 = vadd.f32 %v556_v47, %v555_v45 }
 0x11f   : > { %v549_v51 = vadd.f32 %v548_v48, %v547_v46  ;;  %v558_v52 = vrot.slane %v557_v49, 1 }
 0x121   : > { %v550_v54 = vadd.f32 %v549_v51, %v543_v50  ;;  %v559_v55 = vadd.f32 %v558_v52, %v557_v49 }
 0x123   : > { %551 = vst [vmem:[%s942_s17] sm:$0x1] %v550_v54  ;;  %v560_v56 = vadd.f32 %v559_v55, %v552_v53 }
 0x125   : > { %561 = vst [vmem:[%s947_s20] sm:$0x1] %v560_v56 }
 0x126 PF: > { %s17_s25 = sadd.s32 1, %s827_s25   ;;  %s980_s21 = smov %s815_s22 }
 0x127   : > { %p14_p10 = scmp.ge.s32.totalorder %s17_s25, 4   ;;  %s981_s22 = smov %s905_s30 }
 0x128   : > { %s982_s23 = smov %s823_s24  ;;  %s983_s24 = smov %s985_s26 }
 0x129   :  { %16 = sbr.rel (!%p14_p10) target bundleno = 3 (0x3), region = 189 }

</bundles_post_ra>
